<compile_context>
chip_gen: v7x
topology: tpu7x:2x2x1
jax: 0.10.0
libtpu: 0.0.40
codegen_flags: <defaults>
</compile_context>

<pallas_src>
import math
import functools

import jax
import jax.numpy as jnp
from jax.experimental import pallas as pl
from jax.experimental.pallas import tpu as pltpu


def _round_up(x, m):
    return (x + m - 1) // m * m


# ----------------------------------------------------------------------------
# Pallas kernel: fused MFCC pipeline + per-block partial L1 sums.
# ----------------------------------------------------------------------------
def _make_mfcc_loss_kernel(bb, f_pad, n_frames, top_db_ln, amin):
    """bb batch elems per block; rows layout = [hat b0..b_{bb-1} | y b0..b_{bb-1}],
    each group = f_pad frames (only the first n_frames are real)."""
    half = bb * f_pad          # rows of the y_hat half
    groups = 2 * bb            # (batch, signal) groups for the top_db clamp

    def kernel(fr_ref, w_ref, fb_ref, dct_ref, out_ref):
        frames = fr_ref[...]                                     # (2*bb*f_pad, n_fft)

        # Windowed real DFT: hann folded into the stacked [cos | sin] RHS.
        spec = jnp.dot(frames, w_ref[...],
                       preferred_element_type=jnp.float32)       # (rows, KP)
        sq = spec * spec                                         # re^2 / im^2 per col

        # Mel filterbank row-stacked so re^2 and im^2 land in the same mel bin.
        mel = jnp.dot(sq, fb_ref[...],
                      preferred_element_type=jnp.float32)        # (rows, MP)

        # AmplitudeToDB('power', top_db=80) in the natural-log domain; the 10/ln10
        # scale is folded into the DCT RHS.  Padded mel cols give ln(amin), which
        # never exceeds the true per-group max.
        ln_p = jnp.log(jnp.maximum(mel, amin))                   # (rows, MP)

        mp = ln_p.shape[-1]
        ln3 = ln_p.reshape(groups, f_pad, mp)                    # tile-aligned reshape
        gmax = jnp.max(ln3, axis=2, keepdims=True)               # lane reduce (XLU)
        gmax = jnp.max(gmax, axis=1, keepdims=True)              # (groups, 1, 1)
        ln3 = jnp.maximum(ln3, gmax - top_db_ln)                 # per-(batch,signal) clamp
        ln_p = ln3.reshape(groups * f_pad, mp)

        # DCT-II (ortho) over the mel axis, dB scale folded in. Padded ln cols hit
        # zero DCT rows; padded MFCC cols are zero for both signals.
        mfcc = jnp.dot(ln_p, dct_ref[...],
                       preferred_element_type=jnp.float32)       # (rows, CP)

        cp = mfcc.shape[-1]
        diff = mfcc[:half] - mfcc[half:]                         # (half, CP), 8-aligned slice
        # Mask zero-padded frame rows: their top_db floor differs between signals,
        # so they would otherwise bias the loss.
        frame_ids = jax.lax.broadcasted_iota(jnp.int32, (half, cp), 0) % f_pad
        absd = jnp.where(frame_ids < n_frames, jnp.abs(diff), 0.0)

        partial = jnp.sum(absd, axis=0, keepdims=True)           # (1, CP) lane-dense
        out_ref[...] = partial.reshape(1, 1, cp)

    return kernel


# ----------------------------------------------------------------------------
# Parameter construction (matches torchaudio defaults, built deterministically).
# ----------------------------------------------------------------------------
def _hann_window(n_fft):
    n = jnp.arange(n_fft, dtype=jnp.float32)
    return 0.5 * (1.0 - jnp.cos(2.0 * jnp.pi * n / n_fft))       # periodic hann


def _dft_matrices(n_fft):
    n_freqs = n_fft // 2 + 1
    k = jnp.arange(n_freqs, dtype=jnp.float32)[:, None]
    n = jnp.arange(n_fft, dtype=jnp.float32)[None, :]
    ang = 2.0 * jnp.pi * k * n / n_fft
    return jnp.cos(ang), -jnp.sin(ang)                           # (n_freqs, n_fft)


def _mel_fbank(n_freqs, f_min, f_max, n_mels, sample_rate):
    # htk mel scale, norm=None (torchaudio melscale_fbanks defaults)
    def hz_to_mel(f):
        return 2595.0 * jnp.log10(1.0 + f / 700.0)

    def mel_to_hz(m):
        return 700.0 * (jnp.power(10.0, m / 2595.0) - 1.0)

    all_freqs = jnp.linspace(0.0, sample_rate / 2.0, n_freqs)
    m_pts = jnp.linspace(hz_to_mel(jnp.float32(f_min)),
                         hz_to_mel(jnp.float32(f_max)), n_mels + 2)
    f_pts = mel_to_hz(m_pts)
    f_diff = f_pts[1:] - f_pts[:-1]
    slopes = f_pts[None, :] - all_freqs[:, None]                 # (n_freqs, n_mels+2)
    down = -slopes[:, :-2] / f_diff[:-1]
    up = slopes[:, 2:] / f_diff[1:]
    return jnp.maximum(0.0, jnp.minimum(down, up)).astype(jnp.float32)


def _create_dct(n_mfcc, n_mels):
    # dct_type=2, norm='ortho'
    n = jnp.arange(n_mels, dtype=jnp.float32)
    k = jnp.arange(n_mfcc, dtype=jnp.float32)[:, None]
    dct = jnp.cos(math.pi / n_mels * (n + 0.5) * k)              # (n_mfcc, n_mels)
    dct = dct.at[0].multiply(1.0 / math.sqrt(2.0))
    dct = dct * math.sqrt(2.0 / n_mels)
    return dct.T                                                 # (n_mels, n_mfcc)


def _build_fused_constants(sample_rate, n_mfcc, n_fft, n_mels):
    """Fused, transposed, lane-padded constant matrices for the kernel."""
    f_min, f_max = 0.0, sample_rate / 2.0
    n_freqs = n_fft // 2 + 1
    kp = _round_up(2 * n_freqs, 128)     # stacked [re | im] spectrum width
    mp = _round_up(n_mels, 128)          # mel width
    cp = _round_up(n_mfcc, 128)          # mfcc width

    win = _hann_window(n_fft)                                    # (n_fft,)
    cos_m, sin_m = _dft_matrices(n_fft)                          # (n_freqs, n_fft)
    w_mat = jnp.zeros((n_fft, kp), jnp.float32)
    w_mat = w_mat.at[:, :n_freqs].set((cos_m * win[None, :]).T)
    w_mat = w_mat.at[:, n_freqs:2 * n_freqs].set((sin_m * win[None, :]).T)

    fbank = _mel_fbank(n_freqs, f_min, f_max, n_mels, sample_rate)  # (n_freqs, n_mels)
    fb_mat = jnp.zeros((kp, mp), jnp.float32)
    fb_mat = fb_mat.at[:n_freqs, :n_mels].set(fbank)             # re^2 rows
    fb_mat = fb_mat.at[n_freqs:2 * n_freqs, :n_mels].set(fbank)  # im^2 rows

    # Fold the 10/ln(10) dB scale into the DCT RHS (kernel works in natural log).
    dct_m = _create_dct(n_mfcc, n_mels) * (10.0 / math.log(10.0))
    dct_mat = jnp.zeros((mp, cp), jnp.float32)
    dct_mat = dct_mat.at[:n_mels, :n_mfcc].set(dct_m)
    return w_mat, fb_mat, dct_mat


def _frame(signal, n_fft, hop):
    """signal: (B, T) -> frames (B, n_frames, n_fft), center=True reflect pad.

    Uses a strided-reshape/concat (no XLA gather) when hop divides n_fft.
    """
    pad = n_fft // 2
    padded = jnp.pad(signal, ((0, 0), (pad, pad)), mode='reflect')
    t_padded = padded.shape[-1]
    n_frames = 1 + (t_padded - n_fft) // hop
    if n_fft % hop == 0:
        r = n_fft // hop
        n_chunks = n_frames + r - 1
        chunks = padded[:, :n_chunks * hop].reshape(padded.shape[0], n_chunks, hop)
        frames = jnp.concatenate(
            [chunks[:, j:j + n_frames] for j in range(r)], axis=-1)  # (B, F, n_fft)
    else:
        # TODO(synk): for hop not dividing n_fft, fall back to gather-based framing.
        idx = (jnp.arange(n_frames)[:, None] * hop
               + jnp.arange(n_fft)[None, :])
        frames = padded[:, idx]
    return frames


# ----------------------------------------------------------------------------
# Wrapper
# ----------------------------------------------------------------------------
@functools.partial(jax.jit, static_argnames=(
    'sample_rate', 'n_mfcc', 'n_fft', 'hop_length', 'n_mels'))
def mfcc_loss(y_hat, y, *, sample_rate=16000, n_mfcc=16,
              n_fft=64, hop_length=32, n_mels=32):
    """MFCCLoss.forward: mean |MFCC(y_hat) - MFCC(y)|.  y_hat, y: (B, 1, T)."""
    assert y_hat.shape == y.shape and y_hat.shape[1] == 1
    B, _, T = y_hat.shape
    yh = y_hat.reshape(B, T).astype(jnp.float32)
    yr = y.reshape(B, T).astype(jnp.float32)

    frames_hat = _frame(yh, n_fft, hop_length)                   # (B, F, n_fft)
    frames_y = _frame(yr, n_fft, hop_length)
    n_frames = frames_hat.shape[1]
    f_pad = _round_up(n_frames, 8)                               # 8-aligned frame rows

    if f_pad != n_frames:
        padf = ((0, 0), (0, f_pad - n_frames), (0, 0))
        frames_hat = jnp.pad(frames_hat, padf)                   # masked out in-kernel
        frames_y = jnp.pad(frames_y, padf)

    # Batch-block size: fill the MXU M dim (>= ~512 rows/step) while keeping at
    # least 2 grid steps when B > 1 (so both v7x TensorCores get work).
    rows_per_batch = 2 * f_pad
    bb = max(1, min(B, 512 // rows_per_batch))
    if bb >= B and B > 1:
        bb = (B + 1) // 2
    nblocks = -(-B // bb)
    b_pad = nblocks * bb
    if b_pad != B:
        padb = ((0, b_pad - B), (0, 0), (0, 0))
        frames_hat = jnp.pad(frames_hat, padb)   # zero-signal batches -> exactly zero diff
        frames_y = jnp.pad(frames_y, padb)

    # Per-block row layout: [hat frames of bb batches | y frames of bb batches].
    fh = frames_hat.reshape(nblocks, bb, f_pad, n_fft)
    fy = frames_y.reshape(nblocks, bb, f_pad, n_fft)
    rows = 2 * bb * f_pad
    frames_flat = jnp.concatenate([fh, fy], axis=1).reshape(nblocks * rows, n_fft)

    w_mat, fb_mat, dct_mat = _build_fused_constants(
        sample_rate, n_mfcc, n_fft, n_mels)
    cp = dct_mat.shape[1]

    top_db_ln = 80.0 * math.log(10.0) / 10.0                     # top_db in ln domain
    kernel = _make_mfcc_loss_kernel(bb, f_pad, n_frames, top_db_ln, 1e-10)

    out = pl.pallas_call(
        kernel,
        out_shape=jax.ShapeDtypeStruct((nblocks, 1, cp), jnp.float32),
        grid=(nblocks,),
        in_specs=[
            pl.BlockSpec((rows, n_fft), lambda i: (i, 0)),
            # Grid-invariant index_maps: constants stay VMEM-resident across steps.
            pl.BlockSpec(w_mat.shape, lambda i: (0, 0)),
            pl.BlockSpec(fb_mat.shape, lambda i: (0, 0)),
            pl.BlockSpec(dct_mat.shape, lambda i: (0, 0)),
        ],
        out_specs=pl.BlockSpec((1, 1, cp), lambda i: (i, 0, 0)),
        compiler_params=pltpu.CompilerParams(
            dimension_semantics=("parallel",),
            vmem_limit_bytes=32 * 1024 * 1024),
    )(frames_flat, w_mat, fb_mat, dct_mat)

    # Per-block, per-lane partial L1 sums -> mean over the TRUE element count.
    return jnp.sum(out) / (B * n_frames * n_mfcc)


if __name__ == "__main__":
    key = jax.random.PRNGKey(0)
    k1, k2 = jax.random.split(key)
    B, T = 2, 256                      # small shapes: (B, 1, T)
    y_hat = jax.random.normal(k1, (B, 1, T), dtype=jnp.float32)
    y = jax.random.normal(k2, (B, 1, T), dtype=jnp.float32)

    loss = mfcc_loss(y_hat, y, sample_rate=16000, n_mfcc=16,
                     n_fft=64, hop_length=32, n_mels=32)
    loss = jax.block_until_ready(loss)
    assert jnp.isfinite(loss), f"non-finite loss: {loss}"
    print("KERNEL_OK")
</pallas_src>

<mosaic_0001>
module attributes {stable_mosaic.version = 11 : i64} {
  func.func @kernel(%arg0: i32, %arg1: memref<32x64xf32, #tpu.memory_space<vmem>>, %arg2: memref<64x128xf32, #tpu.memory_space<vmem>>, %arg3: memref<128x128xf32, #tpu.memory_space<vmem>>, %arg4: memref<128x128xf32, #tpu.memory_space<vmem>>, %arg5: memref<1x1x128xf32, #tpu.memory_space<vmem>>) attributes {dimension_semantics = [#tpu.dimension_semantics<parallel>], iteration_bounds = array<i64: 2>, scalar_prefetch = 0 : i64, scratch_operands = 0 : i64, tpu.core_type = #tpu.core_type<tc>, window_params = [{transform_indices = @transform_0, window_bounds = array<i64: 32, 64>}, {pipeline_mode = #tpu.pipeline_mode<synchronous>, transform_indices = @transform_1, window_bounds = array<i64: 64, 128>}, {pipeline_mode = #tpu.pipeline_mode<synchronous>, transform_indices = @transform_2, window_bounds = array<i64: 128, 128>}, {pipeline_mode = #tpu.pipeline_mode<synchronous>, transform_indices = @transform_3, window_bounds = array<i64: 128, 128>}, {transform_indices = @transform_4, window_bounds = array<i64: 1, 1, 128>}]} {
    %c0 = arith.constant 0 : index
    %c0_0 = arith.constant 0 : index
    %0 = vector.load %arg1[%c0, %c0_0] : memref<32x64xf32, #tpu.memory_space<vmem>>, vector<32x64xf32>
    %c0_1 = arith.constant 0 : index
    %c0_2 = arith.constant 0 : index
    %1 = vector.load %arg2[%c0_1, %c0_2] : memref<64x128xf32, #tpu.memory_space<vmem>>, vector<64x128xf32>
    %cst = arith.constant dense<0.000000e+00> : vector<32x128xf32>
    %2 = tpu.matmul %0, %1, %cst {dimension_numbers = #tpu.dot_dimension_numbers<[1], [0], [0], [1], [0, 0, 1, 1], [], []>} : vector<32x64xf32>, vector<64x128xf32>, vector<32x128xf32> -> vector<32x128xf32>
    %3 = arith.mulf %2, %2 : vector<32x128xf32>
    %c0_3 = arith.constant 0 : index
    %c0_4 = arith.constant 0 : index
    %4 = vector.load %arg3[%c0_3, %c0_4] : memref<128x128xf32, #tpu.memory_space<vmem>>, vector<128x128xf32>
    %cst_5 = arith.constant dense<0.000000e+00> : vector<32x128xf32>
    %5 = tpu.matmul %3, %4, %cst_5 {dimension_numbers = #tpu.dot_dimension_numbers<[1], [0], [0], [1], [0, 0, 1, 1], [], []>} : vector<32x128xf32>, vector<128x128xf32>, vector<32x128xf32> -> vector<32x128xf32>
    %cst_6 = arith.constant 1.000000e-10 : f32
    %6 = vector.broadcast %cst_6 : f32 to vector<32x128xf32>
    %7 = arith.maximumf %5, %6 : vector<32x128xf32>
    %8 = math.log %7 : vector<32x128xf32>
    %9 = vector.shape_cast %8 : vector<32x128xf32> to vector<2x16x128xf32>
    %cst_7 = arith.constant dense<0xFF800000> : vector<2x16xf32>
    %10 = vector.multi_reduction <maximumf>, %9, %cst_7 [2] : vector<2x16x128xf32> to vector<2x16xf32>
    %11 = vector.shape_cast %10 : vector<2x16xf32> to vector<2x16x1xf32>
    %cst_8 = arith.constant dense<0xFF800000> : vector<2x1xf32>
    %12 = vector.multi_reduction <maximumf>, %11, %cst_8 [1] : vector<2x16x1xf32> to vector<2x1xf32>
    %13 = vector.shape_cast %12 : vector<2x1xf32> to vector<2x1x1xf32>
    %cst_9 = arith.constant 18.420681 : f32
    %14 = vector.broadcast %cst_9 : f32 to vector<2x1x1xf32>
    %15 = arith.subf %13, %14 : vector<2x1x1xf32>
    %16 = vector.broadcast %15 : vector<2x1x1xf32> to vector<2x16x128xf32>
    %17 = arith.maximumf %9, %16 : vector<2x16x128xf32>
    %18 = vector.shape_cast %17 : vector<2x16x128xf32> to vector<32x128xf32>
    %c0_10 = arith.constant 0 : index
    %c0_11 = arith.constant 0 : index
    %19 = vector.load %arg4[%c0_10, %c0_11] : memref<128x128xf32, #tpu.memory_space<vmem>>, vector<128x128xf32>
    %cst_12 = arith.constant dense<0.000000e+00> : vector<32x128xf32>
    %20 = tpu.matmul %18, %19, %cst_12 {dimension_numbers = #tpu.dot_dimension_numbers<[1], [0], [0], [1], [0, 0, 1, 1], [], []>} : vector<32x128xf32>, vector<128x128xf32>, vector<32x128xf32> -> vector<32x128xf32>
    %21 = vector.extract_strided_slice %20 {offsets = [0, 0], sizes = [16, 128], strides = [1, 1]} : vector<32x128xf32> to vector<16x128xf32>
    %22 = vector.extract_strided_slice %20 {offsets = [16, 0], sizes = [16, 128], strides = [1, 1]} : vector<32x128xf32> to vector<16x128xf32>
    %23 = arith.subf %21, %22 : vector<16x128xf32>
    %24 = tpu.iota {dimensions = array<i32: 0>} : vector<16x128xi32>
    %c16_i32 = arith.constant 16 : i32
    %c0_i32 = arith.constant 0 : i32
    %25 = arith.cmpi eq, %c16_i32, %c0_i32 : i32
    %c1_i32 = arith.constant 1 : i32
    %26 = arith.select %25, %c1_i32, %c16_i32 : i32
    %27 = vector.broadcast %26 : i32 to vector<16x128xi32>
    %28 = arith.remsi %24, %27 : vector<16x128xi32>
    %c0_i32_13 = arith.constant 0 : i32
    %29 = vector.broadcast %c0_i32_13 : i32 to vector<16x128xi32>
    %30 = arith.cmpi ne, %28, %29 : vector<16x128xi32>
    %c0_i32_14 = arith.constant 0 : i32
    %31 = vector.broadcast %c0_i32_14 : i32 to vector<16x128xi32>
    %32 = arith.cmpi slt, %28, %31 : vector<16x128xi32>
    %c0_i32_15 = arith.constant 0 : i32
    %33 = arith.cmpi slt, %26, %c0_i32_15 : i32
    %34 = vector.broadcast %33 : i1 to vector<16x128xi1>
    %35 = vector.broadcast %34 : vector<16x128xi1> to vector<16x128xi1>
    %36 = arith.xori %32, %35 : vector<16x128xi1>
    %37 = arith.andi %36, %30 : vector<16x128xi1>
    %38 = vector.broadcast %26 : i32 to vector<16x128xi32>
    %39 = arith.addi %28, %38 : vector<16x128xi32>
    %40 = arith.select %37, %39, %28 : vector<16x128xi1>, vector<16x128xi32>
    %c9_i32 = arith.constant 9 : i32
    %41 = vector.broadcast %c9_i32 : i32 to vector<16x128xi32>
    %42 = arith.cmpi slt, %40, %41 : vector<16x128xi32>
    %43 = math.absf %23 : vector<16x128xf32>
    %cst_16 = arith.constant 0.000000e+00 : f32
    %44 = vector.broadcast %cst_16 : f32 to vector<16x128xf32>
    %45 = arith.select %42, %43, %44 : vector<16x128xi1>, vector<16x128xf32>
    %cst_17 = arith.constant dense<0.000000e+00> : vector<128xf32>
    %46 = vector.multi_reduction <add>, %45, %cst_17 [0] : vector<16x128xf32> to vector<128xf32>
    %47 = vector.shape_cast %46 : vector<128xf32> to vector<1x128xf32>
    %48 = vector.shape_cast %47 : vector<1x128xf32> to vector<1x1x128xf32>
    %c0_18 = arith.constant 0 : index
    %c0_19 = arith.constant 0 : index
    %c0_20 = arith.constant 0 : index
    %49 = vector.load %arg5[%c0_18, %c0_19, %c0_20] : memref<1x1x128xf32, #tpu.memory_space<vmem>>, vector<1x1x128xf32>
    tpu.vector_store %arg5[%c0_18, %c0_19, %c0_20], %48 {strides = array<i32>} : memref<1x1x128xf32, #tpu.memory_space<vmem>>, vector<1x1x128xf32>,
    return
  }
  func.func @transform_0(%arg0: i32) -> (i32, i32) {
    %c0_i32 = arith.constant 0 : i32
    %c0_i32_0 = arith.constant 0 : i32
    return %arg0, %c0_i32 : i32, i32
  }
  func.func @transform_1(%arg0: i32) -> (i32, i32) {
    %c0_i32 = arith.constant 0 : i32
    %c0_i32_0 = arith.constant 0 : i32
    %c0_i32_1 = arith.constant 0 : i32
    return %c0_i32, %c0_i32_0 : i32, i32
  }
  func.func @transform_2(%arg0: i32) -> (i32, i32) {
    %c0_i32 = arith.constant 0 : i32
    %c0_i32_0 = arith.constant 0 : i32
    %c0_i32_1 = arith.constant 0 : i32
    return %c0_i32, %c0_i32_0 : i32, i32
  }
  func.func @transform_3(%arg0: i32) -> (i32, i32) {
    %c0_i32 = arith.constant 0 : i32
    %c0_i32_0 = arith.constant 0 : i32
    %c0_i32_1 = arith.constant 0 : i32
    return %c0_i32, %c0_i32_0 : i32, i32
  }
  func.func @transform_4(%arg0: i32) -> (i32, i32, i32) {
    %c0_i32 = arith.constant 0 : i32
    %c0_i32_0 = arith.constant 0 : i32
    %c0_i32_1 = arith.constant 0 : i32
    return %arg0, %c0_i32, %c0_i32_0 : i32, i32, i32
  }
}

</mosaic_0001>

<bundles_post_ra>
// kernel: mfcc_loss.1
= control target key start
LH: loop header
LB: loop body
LE: loop exit
PB: predicated region body
PF: predicated region fallthrough
CT: control target
= control target key end

     0   :  { %s936_s15 = smov 0   ;;  %s1082_s0 = inlined_call_operand.vmem [shape: f32[64,64], index: 0, kind: input, shape index: {}]   ;;  %s1083_s1 = inlined_call_operand.vmem [shape: f32[64,128], index: 1, kind: input, shape index: {}]   ;;  %s1084_s2 = inlined_call_operand.vmem [shape: f32[128,128], index: 2, kind: input, shape index: {}]   ;;  %s1085_s3 = inlined_call_operand.vmem [shape: f32[128,128], index: 3, kind: input, shape index: {}]   ;;  %s1086_s4 = inlined_call_operand.vmem [shape: f32[2,1,128], index: 4, kind: output, shape index: {}]  }
   0x1 LB: > { %s942_s16 = sadd.s32 4294967295, %s909_s15   ;;  %p646_p0 = scmp.ge.s32.totalorder %s909_s15, 1  ;;  %s909_s15 = sphi %s936_s15, %s14_s15  }
   0x2   : > { %p163_p1 = scmp.lt.s32.totalorder %s909_s15, 3 }
   0x4   : > { %p164_p2 = pnand %p646_p0, %p163_p1 }
   0x5   : > { %v200_v0 = vld [vmem:[%s1083_s1] sm:$0xff] (!%p164_p2)  ;;  %v201_v1 = vld [vmem:[%s1083_s1 + $0x8] sm:$0xff] (!%p164_p2)  ;;  %v202_v2 = vld [vmem:[%s1083_s1 + $0x10] sm:$0xff] (!%p164_p2)  ;;  %s647_s23 = sshll.u32 (!%p164_p2), %s942_s16, 2  ;;  %vm208_vm0 = vcmask (!%p164_p2), 523264   ;;  %p193_p4 = scmp.lt.s32.totalorder (!%p164_p2), %s942_s16, 1 }
   0x6   : > { %167 = sbr.rel (%p164_p2) target bundleno = 869 (0x365), region = 36  ;;  %v807_v3 = vpack.c.bf16 (!%p164_p2), %v201_v1, %v200_v0  ;;  %v203_v4 = vld [vmem:[%s1083_s1 + $0x18] sm:$0xff] (!%p164_p2)  ;;  %p188_p3 = scmp.lt.s32.totalorder (!%p164_p2), %s647_s23, 7  ;;  %v204_v6 = vld [vmem:[%s1083_s1 + $0x20] sm:$0xff] (!%p164_p2)  ;;  %v205_v7 = vld [vmem:[%s1083_s1 + $0x28] sm:$0xff] (!%p164_p2) }
   0x7   : > { %v811_v5 = vpack.c.bf16 (!%p164_p2), %v203_v4, %v202_v2  ;;  %v310_v8 = vld [vmem:[%s1084_s2] sm:$0xff] (!%p164_p2)  ;;  %v311_v9 = vld [vmem:[%s1084_s2 + $0x8] sm:$0xff] (!%p164_p2)  ;;  %v312_v10 = vld [vmem:[%s1084_s2 + $0x10] sm:$0xff] (!%p164_p2)  ;;  %v815_v13 = vpack.c.bf16 (!%p164_p2), %v205_v7, %v204_v6 }
   0x8   : > { %808 = vmatprep.subr.bf16.mxu0 (!%p164_p2), %v807_v3  ;;  %v313_v11 = vld [vmem:[%s1084_s2 + $0x18] sm:$0xff] (!%p164_p2)  ;;  %v823_v12 = vpack.c.bf16 (!%p164_p2), %v311_v9, %v310_v8  ;;  %v314_v15 = vld [vmem:[%s1084_s2 + $0x20] sm:$0xff] (!%p164_p2)  ;;  %v315_v16 = vld [vmem:[%s1084_s2 + $0x28] sm:$0xff] (!%p164_p2) }
   0x9   : > { %810 = vmatpush3.bf16.msra.mxu0 (!%p164_p2), %v807_v3  ;;  %v827_v14 = vpack.c.bf16 (!%p164_p2), %v313_v11, %v312_v10  ;;  %v206_v17 = vld [vmem:[%s1083_s1 + $0x30] sm:$0xff] (!%p164_p2)  ;;  %v207_v18 = vld [vmem:[%s1083_s1 + $0x38] sm:$0xff] (!%p164_p2)  ;;  %v831_v20 = vpack.c.bf16 (!%p164_p2), %v315_v16, %v314_v15  ;;  %v318_v25 = vld [vmem:[%s1084_s2 + $0x40] sm:$0xff] (!%p164_p2) }
   0xa   : > { %812 = vmatprep.subr.bf16.mxu0 (!%p164_p2), %v811_v5  ;;  %824 = vmatprep.subr.bf16.mxu1 (!%p164_p2), %v823_v12  ;;  %v819_v21 = vpack.c.bf16 (!%p164_p2), %v207_v18, %v206_v17  ;;  %v316_v22 = vld [vmem:[%s1084_s2 + $0x30] sm:$0xff] (!%p164_p2)  ;;  %v317_v23 = vld [vmem:[%s1084_s2 + $0x38] sm:$0xff] (!%p164_p2)  ;;  %v319_v26 = vld [vmem:[%s1084_s2 + $0x48] sm:$0xff] (!%p164_p2) }
   0xb   : > { %826 = vmatpush3.bf16.msra.mxu1 (!%p164_p2), %v823_v12  ;;  %v835_v24 = vpack.c.bf16 (!%p164_p2), %v317_v23, %v316_v22  ;;  %v839_v28 = vpack.c.bf16 (!%p164_p2), %v319_v26, %v318_v25  ;;  %v320_v30 = vld [vmem:[%s1084_s2 + $0x50] sm:$0xff] (!%p164_p2)  ;;  %v321_v31 = vld [vmem:[%s1084_s2 + $0x58] sm:$0xff] (!%p164_p2)  ;;  %v322_v34 = vld [vmem:[%s1084_s2 + $0x60] sm:$0xff] (!%p164_p2) }
   0xc   : > { %828 = vmatprep.subr.bf16.mxu1 (!%p164_p2), %v827_v14  ;;  %v843_v33 = vpack.c.bf16 (!%p164_p2), %v321_v31, %v320_v30  ;;  %v323_v35 = vld [vmem:[%s1084_s2 + $0x68] sm:$0xff] (!%p164_p2)  ;;  %v324_v37 = vld [vmem:[%s1084_s2 + $0x70] sm:$0xff] (!%p164_p2)  ;;  %v325_v38 = vld [vmem:[%s1084_s2 + $0x78] sm:$0xff] (!%p164_p2) }
   0xd   : > { %s1088_s23 = smov (!%p188_p3, %s647_s23), 7  ;;  %814 = vmatpush3.bf16.msra.mxu0 %v811_v5  ;;  %v847_v36 = vpack.c.bf16 %v323_v35, %v322_v34  ;;  %v851_v39 = vpack.c.bf16 %v325_v38, %v324_v37  ;;  %v451_v48 = vld [vmem:[%s1085_s3] sm:$0xff]  ;;  %v452_v49 = vld [vmem:[%s1085_s3 + $0x8] sm:$0xff]  ;;  %v453_v50 = vld [vmem:[%s1085_s3 + $0x10] sm:$0xff]  ;;  %s1090_s16 = smov (!%p193_p4, %s942_s16), 1 }
   0xe   : > { %s648_s12 = sshll.u32 %s1088_s23, 3  ;;  %816 = vmatprep.subr.bf16.mxu0 %v815_v13  ;;  %v855_v51 = vpack.c.bf16 %v452_v49, %v451_v48  ;;  %v454_v52 = vld [vmem:[%s1085_s3 + $0x18] sm:$0xff]  ;;  %v455_v54 = vld [vmem:[%s1085_s3 + $0x20] sm:$0xff]  ;;  %v456_v55 = vld [vmem:[%s1085_s3 + $0x28] sm:$0xff]  ;;  %v554_v48 = vlaneseq  ;;  %s195_s6 = scalar_lea.vmem %s1086_s4, %s1090_s16 }
   0xf   : > { %s191_s25 = scalar_lea.vmem %s1082_s0, %s648_s12  ;;  %830 = vmatpush3.bf16.msra.mxu1 %v827_v14  ;;  %v859_v53 = vpack.c.bf16 %v454_v52, %v453_v50  ;;  %v863_v56 = vpack.c.bf16 %v456_v55, %v455_v54  ;;  %v457_v9 = vld [vmem:[%s1085_s3 + $0x30] sm:$0xff]  ;;  %v458_v10 = vld [vmem:[%s1085_s3 + $0x38] sm:$0xff]  ;;  %v459_v12 = vld [vmem:[%s1085_s3 + $0x40] sm:$0xff] }
  0x10   : > { %v196_v19 = vld [vmem:[%s191_s25] sm:$0xff]  ;;  %832 = vmatprep.subr.bf16.mxu1 %v831_v20  ;;  %v197_v27 = vld [vmem:[%s191_s25 + $0x8] sm:$0xff]  ;;  %v198_v29 = vld [vmem:[%s191_s25 + $0x10] sm:$0xff]  ;;  %v867_v11 = vpack.c.bf16 %v458_v10, %v457_v9  ;;  %v555_v49 = vshrl.u32 %v554_v48, 7 }
  0x11   : > { %725 = vmatprep.mubr.msk.f32.mxu0 %vm208_vm0, %v196_v19  ;;  %818 = vmatpush3.bf16.msra.mxu0 %v815_v13  ;;  %v199_v32 = vld [vmem:[%s191_s25 + $0x18] sm:$0xff]  ;;  %v460_v13 = vld [vmem:[%s1085_s3 + $0x48] sm:$0xff]  ;;  %v461_v15 = vld [vmem:[%s1085_s3 + $0x50] sm:$0xff] }
  0x12   : > { %820 = vmatprep.subr.bf16.mxu0 %v819_v21  ;;  %v871_v14 = vpack.c.bf16 %v460_v13, %v459_v12  ;;  %v462_v16 = vld [vmem:[%s1085_s3 + $0x58] sm:$0xff]  ;;  %v463_v18 = vld [vmem:[%s1085_s3 + $0x60] sm:$0xff]  ;;  %v464_v19 = vld [vmem:[%s1085_s3 + $0x68] sm:$0xff]  ;;  %v556_v50 = vadd.s32 8, %v555_v49 }
  0x13   : > { %834 = vmatpush3.bf16.msra.mxu1 %v831_v20  ;;  %v875_v17 = vpack.c.bf16 %v462_v16, %v461_v15  ;;  %v879_v20 = vpack.c.bf16 %v464_v19, %v463_v18  ;;  %v466_v22 = vld [vmem:[%s1085_s3 + $0x78] sm:$0xff] }
  0x14   : > { %836 = vmatprep.subr.bf16.mxu1 %v835_v24 }
  0x15   : > { %822 = vmatpush3.bf16.msra.mxu0 %v819_v21  ;;  %v465_v21 = vld [vmem:[%s1085_s3 + $0x70] sm:$0xff] }
  0x16   : > { %856 = vmatprep.subr.bf16.mxu0 %v855_v51  ;;  %v883_v23 = vpack.c.bf16 %v466_v22, %v465_v21 }
  0x17   : > { %838 = vmatpush3.bf16.msra.mxu1 %v835_v24 }
  0x18   : > { %726 = vmatmul.mubr.msk.f32.vlgmr.msra.gmra.mrb[0].mxu0 %vm208_vm0, %v197_v27  ;;  %840 = vmatprep.subr.bf16.mxu1 %v839_v28 }
  0x19   : > { %728 = vmatprep.mubr.msk.f32.mxu0 %vm208_vm0, %v198_v29  ;;  %858 = vmatpush3.bf16.msra.mxu0 %v855_v51 }
  0x1a   : > { %860 = vmatprep.subr.bf16.mxu0 %v859_v53 }
  0x1b   : > { %842 = vmatpush3.bf16.msra.mxu1 %v839_v28 }
  0x1c   : > { %729 = vmatmul.mubr.msk.f32.gmra.mrb[2].mxu0 %vm208_vm0, %v199_v32  ;;  %844 = vmatprep.subr.bf16.mxu1 %v843_v33 }
  0x1d   : > { %862 = vmatpush3.bf16.msra.mxu0 %v859_v53  ;;  %v568_v53 = vand.u32 15, %v556_v50 }
  0x1e   : > { %864 = vmatprep.subr.bf16.mxu0 %v863_v56 }
  0x1f   : > { %846 = vmatpush3.bf16.msra.mxu1 %v843_v33  ;;  %vm582_vm1 = vcmp.lt.s32.totalorder %v568_v53, 9 }
  0x20   : > { %848 = vmatprep.subr.bf16.mxu1 %v847_v36 }
  0x21   : > { %866 = vmatpush3.bf16.msra.mxu0 %v863_v56 }
  0x22   : > { %868 = vmatprep.subr.bf16.mxu0 %v867_v11 }
  0x23   : > { %850 = vmatpush3.bf16.msra.mxu1 %v847_v36 }
  0x24   : > { %852 = vmatprep.subr.bf16.mxu1 %v851_v39 }
  0x25   : > { %870 = vmatpush3.bf16.msra.mxu0 %v867_v11 }
  0x26   : > { %872 = vmatprep.subr.bf16.mxu0 %v871_v14 }
  0x27   : > { %854 = vmatpush3.bf16.msra.mxu1 %v851_v39 }
  0x29   : > { %874 = vmatpush3.bf16.msra.mxu0 %v871_v14 }
  0x2a   : > { %876 = vmatprep.subr.bf16.mxu0 %v875_v17 }
  0x2d   : > { %878 = vmatpush3.bf16.msra.mxu0 %v875_v17 }
  0x2e   : > { %880 = vmatprep.subr.bf16.mxu0 %v879_v20 }
  0x31   : > { %882 = vmatpush3.bf16.msra.mxu0 %v879_v20 }
  0x32   : > { %884 = vmatprep.subr.bf16.mxu0 %v883_v23 }
  0x35   : > { %886 = vmatpush3.bf16.msra.mxu0 %v883_v23 }
  0xeb   : > { %v727_v40 = vpop.f32.mrb[0].mxu0 }
  0xec   : > { %v287_v41 = vpop.f32.mrb[1].mxu0  ;;  %v307_v43 = vmul.f32 %v727_v40, %v727_v40 }
  0xed   : > { %v306_v42 = vmul.f32 %v287_v41, %v287_v41 }
  0xef   : > { %v730_v44 = vpop.f32.mrb[2].mxu0  ;;  %763 = vmatprep.mubr.f32.mxu1 %v306_v42 }
  0xf0   : > { %v297_v45 = vpop.f32.mrb[3].mxu0  ;;  %764 = vmatmul.mubr.f32.vlgmr.msra.gmra.mrb[0].mxu1 %v307_v43  ;;  %v309_v47 = vmul.f32 %v730_v44, %v730_v44 }
  0xf1   : > { %v308_v46 = vmul.f32 %v297_v45, %v297_v45 }
  0xf3   : > { %766 = vmatprep.mubr.f32.mxu1 %v308_v46 }
  0xf4   : > { %767 = vmatmul.mubr.f32.gmra.mrb[2].mxu1 %v309_v47 }
 0x1c3   : > { %v765_v57 = vpop.f32.mrb[0].mxu1 }
 0x1c4   : > { %v392_v58 = vpop.f32.mrb[1].mxu1  ;;  %v412_v59 = vmax.f32 %v765_v57, 1e-10 }
 0x1c5   : > { %v411_v60 = vmax.f32 %v392_v58, 1e-10 }
 0x1c7   : > { %895 = vlog2.f32 %v411_v60  ;;  %v768_v61 = vpop.f32.mrb[2].mxu1 }
 0x1c8   : > { %v402_v62 = vpop.f32.mrb[3].mxu1  ;;  %897 = vlog2.f32 %v412_v59  ;;  %v414_v63 = vmax.f32 %v768_v61, 1e-10 }
 0x1c9   : > { %v413_v0 = vmax.f32 %v402_v62, 1e-10 }
 0x1cb   : > { %899 = vlog2.f32 %v413_v0 }
 0x1cc   : > { %901 = vlog2.f32 %v414_v63 }
 0x1d1   : > { %v896_v1 = vpop.eup %895 }
 0x1d2   : > { %v416_v2 = vmul.f32 0.6931472, %v896_v1  ;;  %v898_v3 = vpop.eup %897 }
 0x1d3   : > { %v418_v5 = vmul.f32 0.6931472, %v898_v3 }
 0x1d4   : > { %423 = vmax.xlane.f32.xlu0 %v416_v2 }
 0x1d5   : > { %v900_v4 = vpop.eup %899 }
 0x1d6   : > { %v420_v6 = vmul.f32 0.6931472, %v900_v4  ;;  %v902_v7 = vpop.eup %901 }
 0x1d7   : > { %v422_v8 = vmul.f32 0.6931472, %v902_v7 }
 0x1d8   : > { %425 = vmax.xlane.f32.xlu0 %v418_v5  ;;  %427 = vmax.xlane.f32.xlu1 %v420_v6 }
 0x1dc   : > { %429 = vmax.xlane.f32.xlu1 %v422_v8 }
 0x261   : > { %v424_v24 = vpop.xlane.xlu0 %423 }
 0x265   : > { %v426_v25 = vpop.xlane.xlu0 %425  ;;  %v428_v26 = vpop.xlane.xlu1 %427 }
 0x266   : > { %v431_v27 = vmax.f32 %v424_v24, %v426_v25 }
 0x268   : > { %v432_v28 = vrot.slane %v431_v27, 4 }
 0x269   : > { %v430_v29 = vpop.xlane.xlu1 %429 }
 0x26a   : > { %v433_v30 = vmax.f32 %v431_v27, %v432_v28  ;;  %v438_v31 = vmax.f32 %v428_v26, %v430_v29 }
 0x26c   : > { %v434_v32 = vrot.slane %v433_v30, 2  ;;  %v439_v33 = vrot.slane %v438_v31, 4 }
 0x26e   : > { %v435_v34 = vmax.f32 %v433_v30, %v434_v32  ;;  %v440_v35 = vmax.f32 %v438_v31, %v439_v33 }
 0x270   : > { %v436_v36 = vrot.slane %v435_v34, 1  ;;  %v441_v37 = vrot.slane %v440_v35, 2 }
 0x272   : > { %v442_v38 = vmax.f32 %v440_v35, %v441_v37  ;;  %v437_v39 = vmax.f32 %v435_v34, %v436_v36 }
 0x274   : > { %v443_v40 = vrot.slane %v442_v38, 1  ;;  %v653_v41 = vadd.f32 -18.420681, %v437_v39 }
 0x276   : > { %v447_v42 = vmax.f32 %v416_v2, %v653_v41  ;;  %v448_v43 = vmax.f32 %v418_v5, %v653_v41  ;;  %v444_v44 = vmax.f32 %v442_v38, %v443_v40 }
 0x278   : > { %801 = vmatprep.mubr.f32.mxu0 %v447_v42  ;;  %v654_v45 = vadd.f32 -18.420681, %v444_v44 }
 0x279   : > { %802 = vmatmul.mubr.f32.vlgmr.msra.gmra.mrb[4].mxu0 %v448_v43 }
 0x27a   : > { %v449_v46 = vmax.f32 %v420_v6, %v654_v45  ;;  %v450_v47 = vmax.f32 %v422_v8, %v654_v45 }
 0x27c   : > { %804 = vmatprep.mubr.f32.mxu0 %v449_v46 }
 0x27d   : > { %805 = vmatmul.mubr.f32.gmra.mrb[6].mxu0 %v450_v47 }
 0x34c   : > { %v803_v51 = vpop.f32.mrb[4].mxu0 }
 0x34d   : > { %v533_v52 = vpop.f32.mrb[5].mxu0 }
 0x350   : > { %v806_v54 = vpop.f32.mrb[6].mxu0 }
 0x351   : > { %v553_v55 = vsub.f32 %v803_v51, %v806_v54  ;;  %v543_v56 = vpop.f32.mrb[7].mxu0 }
 0x352   : > { %v552_v57 = vsub.f32 %v533_v52, %v543_v56 }
 0x353   : > { %v584_v58 = vand.u32 2147483647, %v553_v55 }
 0x354   : > { %v583_v59 = vand.u32 2147483647, %v552_v57 }
 0x355   : > { %v586_v60 = vsel %vm582_vm1, %v584_v58, 0.0 }
 0x356   : > { %v587_v61 = vadd.f32 %v586_v60, %v583_v59 }
 0x358   : > { %v588_v62 = vrot.slane %v587_v61, 4 }
 0x35a   : > { %v589_v63 = vadd.f32 %v588_v62, %v587_v61 }
 0x35c   : > { %v590_v0 = vrot.slane %v589_v63, 2 }
 0x35e   : > { %v591_v1 = vadd.f32 %v590_v0, %v589_v63 }
 0x360   : > { %v592_v2 = vrot.slane %v591_v1, 1 }
 0x362   : > { %v593_v3 = vadd.f32 %v592_v2, %v591_v1 }
 0x364   : > { %594 = vst [vmem:[%s195_s6] sm:$0x1] %v593_v3 }
 0x365 PF: > { %s14_s15 = sadd.s32 1, %s909_s15  }
 0x366   : > { %p11_p5 = scmp.ge.s32.totalorder %s14_s15, 4  }
 0x368   :  { %13 = sbr.rel (!%p11_p5) target bundleno = 1 (0x1), region = 66 }

</bundles_post_ra>
